<compile_context>
chip_gen: v7x
topology: tpu7x:2x2x1
jax: 0.10.0
libtpu: 0.0.40
codegen_flags: <defaults>
</compile_context>

<pallas_src>
import functools

import jax
import jax.numpy as jnp
from jax.experimental import pallas as pl
from jax.experimental.pallas import tpu as pltpu

NUM_EXPERTS = 4


def moe_kernel(x_ref, wcat_ref, bcat_ref, r_ref, s_ref, o_ref, *,
               num_experts, out_features):
    E = num_experts
    EO = E * out_features

    x = x_ref[...]                                                   # (TB, D) f32

    # --- one fused MXU push for all experts + the gate logits ---
    fused = jnp.dot(x, wcat_ref[...],
                    preferred_element_type=jnp.float32) + bcat_ref[...]   # (TB, EO+E)
    experts = fused[:, :EO]          # (TB, E*O)  lane-aligned slice
    logits = fused[:, EO:]           # (TB, E)    gate logits

    # --- gating: max-stabilized softmax over the expert axis ---
    m = jnp.max(logits, axis=-1, keepdims=True)
    p = jnp.exp(logits - m)
    denom = jnp.sum(p, axis=-1, keepdims=True)
    gate = p * pl.reciprocal(denom, approx=True)                     # (TB, E)

    # --- single hoisted broadcast of gate to (TB, E*O): tiny MXU push against a
    #     constant 0/1 expansion matrix (no per-expert lane slices / broadcasts) ---
    gate_rep = jnp.dot(gate, r_ref[...],
                       preferred_element_type=jnp.float32)           # (TB, E*O)

    # --- weighted combine: one multiply + one MXU reduction over experts via a
    #     constant 0/1 selection matrix (lane-dense, no reshapes) ---
    out = jnp.dot(experts * gate_rep, s_ref[...],
                  preferred_element_type=jnp.float32)                # (TB, O)
    o_ref[...] = out.astype(o_ref.dtype)


def mixture_of_experts(x, w_experts, b_experts, w_gate, b_gate):
    B, D = x.shape
    E, D2, O = w_experts.shape
    assert D2 == D and E == NUM_EXPERTS
    EO = E * O
    dt = x.dtype

    # Fuse all weights / biases into single matrices (wrapper-side, cheap, static).
    w_e_flat = jnp.transpose(w_experts, (1, 0, 2)).reshape(D, EO)    # col e*O+o = W_e[:,o]
    w_cat = jnp.concatenate([w_e_flat, w_gate], axis=1)              # (D, EO + E)
    b_cat = jnp.concatenate([b_experts.reshape(1, EO),
                             b_gate.reshape(1, E)], axis=1)          # (1, EO + E)

    # Constant 0/1 matrices: R copies gate_e into expert-e's O columns,
    # S sums the E column blocks back down to O outputs.
    r_mat = jnp.kron(jnp.eye(E, dtype=dt), jnp.ones((1, O), dtype=dt))   # (E, EO)
    s_mat = jnp.kron(jnp.ones((E, 1), dtype=dt), jnp.eye(O, dtype=dt))   # (EO, O)

    # Batch tiling: biggest divisor tile from a small candidate list (grid=(1,) at B=8).
    tb = B
    for cand in (512, 256, 128, 64, 32, 16, 8):
        if B >= cand and B % cand == 0:
            tb = cand
            break
    grid = (B // tb,)

    kernel = functools.partial(moe_kernel, num_experts=E, out_features=O)
    return pl.pallas_call(
        kernel,
        out_shape=jax.ShapeDtypeStruct((B, O), jnp.float32),
        grid=grid,
        in_specs=[
            pl.BlockSpec((tb, D), lambda i: (i, 0)),        # x tile
            pl.BlockSpec((D, EO + E), lambda i: (0, 0)),    # fused weights (resident)
            pl.BlockSpec((1, EO + E), lambda i: (0, 0)),    # fused bias    (resident)
            pl.BlockSpec((E, EO), lambda i: (0, 0)),        # gate expansion (resident)
            pl.BlockSpec((EO, O), lambda i: (0, 0)),        # expert reduction (resident)
        ],
        out_specs=pl.BlockSpec((tb, O), lambda i: (i, 0)),
        compiler_params=pltpu.CompilerParams(
            dimension_semantics=("parallel",)),
    )(x, w_cat, b_cat, r_mat, s_mat)


def moe_reference(x, w_experts, b_experts, w_gate, b_gate):
    # Pure-JAX reference mirroring the PyTorch forward.
    expert_outputs = jnp.einsum('bd,edo->beo', x, w_experts) + b_experts[None]   # (B,E,O)
    logits = x @ w_gate + b_gate                                                 # (B,E)
    gate = jax.nn.softmax(logits, axis=1)
    return jnp.sum(gate[:, :, None] * expert_outputs, axis=1)                    # (B,O)


if __name__ == "__main__":
    # Small shapes consistent with the module's forward: x is (batch, input_size).
    B, D, O, E = 8, 32, 8, NUM_EXPERTS

    key = jax.random.PRNGKey(0)
    kx, kwe, kbe, kwg, kbg = jax.random.split(key, 5)

    x = jax.random.normal(kx, (B, D), dtype=jnp.float32)
    # Expert weights stacked as (E, D, O) (torch Linear weight (O, D) transposed),
    # gate weight as (D, E).
    w_experts = jax.random.normal(kwe, (E, D, O), dtype=jnp.float32) * 0.1
    b_experts = jax.random.normal(kbe, (E, O), dtype=jnp.float32) * 0.1
    w_gate = jax.random.normal(kwg, (D, E), dtype=jnp.float32) * 0.1
    b_gate = jax.random.normal(kbg, (1, E), dtype=jnp.float32) * 0.1

    out = mixture_of_experts(x, w_experts, b_experts, w_gate, b_gate)
    out = jax.block_until_ready(out)

    ref = moe_reference(x, w_experts, b_experts, w_gate, b_gate.reshape(E))
    assert out.shape == (B, O)
    # Tolerance loosened vs 1e-5 because the softmax denominator uses the EUP
    # approx reciprocal (pl.reciprocal(..., approx=True)).
    assert jnp.allclose(out, ref, atol=1e-2, rtol=1e-2), "mismatch vs reference"

    print("KERNEL_OK")
</pallas_src>

<mosaic_0001>
module attributes {stable_mosaic.version = 11 : i64} {
  func.func @moe_kernel(%arg0: i32, %arg1: memref<8x32xf32, #tpu.memory_space<vmem>>, %arg2: memref<32x36xf32, #tpu.memory_space<vmem>>, %arg3: memref<1x36xf32, #tpu.memory_space<vmem>>, %arg4: memref<4x32xf32, #tpu.memory_space<vmem>>, %arg5: memref<32x8xf32, #tpu.memory_space<vmem>>, %arg6: memref<8x8xf32, #tpu.memory_space<vmem>>) attributes {dimension_semantics = [#tpu.dimension_semantics<parallel>], iteration_bounds = array<i64: 1>, scalar_prefetch = 0 : i64, scratch_operands = 0 : i64, tpu.core_type = #tpu.core_type<tc>, window_params = [{transform_indices = @transform_0, window_bounds = array<i64: 8, 32>}, {pipeline_mode = #tpu.pipeline_mode<synchronous>, transform_indices = @transform_1, window_bounds = array<i64: 32, 36>}, {pipeline_mode = #tpu.pipeline_mode<synchronous>, transform_indices = @transform_2, window_bounds = array<i64: 1, 36>}, {pipeline_mode = #tpu.pipeline_mode<synchronous>, transform_indices = @transform_3, window_bounds = array<i64: 4, 32>}, {pipeline_mode = #tpu.pipeline_mode<synchronous>, transform_indices = @transform_4, window_bounds = array<i64: 32, 8>}, {transform_indices = @transform_5, window_bounds = array<i64: 8, 8>}]} {
    %c0 = arith.constant 0 : index
    %c0_0 = arith.constant 0 : index
    %0 = vector.load %arg1[%c0, %c0_0] : memref<8x32xf32, #tpu.memory_space<vmem>>, vector<8x32xf32>
    %c0_1 = arith.constant 0 : index
    %c0_2 = arith.constant 0 : index
    %1 = vector.load %arg2[%c0_1, %c0_2] : memref<32x36xf32, #tpu.memory_space<vmem>>, vector<32x36xf32>
    %cst = arith.constant dense<0.000000e+00> : vector<8x36xf32>
    %2 = tpu.matmul %0, %1, %cst {dimension_numbers = #tpu.dot_dimension_numbers<[1], [0], [0], [1], [0, 0, 1, 1], [], []>} : vector<8x32xf32>, vector<32x36xf32>, vector<8x36xf32> -> vector<8x36xf32>
    %c0_3 = arith.constant 0 : index
    %c0_4 = arith.constant 0 : index
    %3 = vector.load %arg3[%c0_3, %c0_4] : memref<1x36xf32, #tpu.memory_space<vmem>>, vector<1x36xf32>
    %4 = vector.broadcast %3 : vector<1x36xf32> to vector<8x36xf32>
    %5 = arith.addf %2, %4 : vector<8x36xf32>
    %6 = vector.extract_strided_slice %5 {offsets = [0, 0], sizes = [8, 32], strides = [1, 1]} : vector<8x36xf32> to vector<8x32xf32>
    %7 = vector.extract_strided_slice %5 {offsets = [0, 32], sizes = [8, 4], strides = [1, 1]} : vector<8x36xf32> to vector<8x4xf32>
    %cst_5 = arith.constant dense<0xFF800000> : vector<8xf32>
    %8 = vector.multi_reduction <maximumf>, %7, %cst_5 [1] : vector<8x4xf32> to vector<8xf32>
    %9 = vector.shape_cast %8 : vector<8xf32> to vector<8x1xf32>
    %10 = vector.broadcast %9 : vector<8x1xf32> to vector<8x4xf32>
    %11 = arith.subf %7, %10 : vector<8x4xf32>
    %12 = math.exp %11 : vector<8x4xf32>
    %cst_6 = arith.constant dense<0.000000e+00> : vector<8xf32>
    %13 = vector.multi_reduction <add>, %12, %cst_6 [1] : vector<8x4xf32> to vector<8xf32>
    %14 = vector.shape_cast %13 : vector<8xf32> to vector<8x1xf32>
    %15 = tpu.reciprocal %14 {approx = true} : vector<8x1xf32> -> vector<8x1xf32>
    %16 = vector.broadcast %15 : vector<8x1xf32> to vector<8x4xf32>
    %17 = arith.mulf %12, %16 : vector<8x4xf32>
    %c0_7 = arith.constant 0 : index
    %c0_8 = arith.constant 0 : index
    %18 = vector.load %arg4[%c0_7, %c0_8] : memref<4x32xf32, #tpu.memory_space<vmem>>, vector<4x32xf32>
    %cst_9 = arith.constant dense<0.000000e+00> : vector<8x32xf32>
    %19 = tpu.matmul %17, %18, %cst_9 {dimension_numbers = #tpu.dot_dimension_numbers<[1], [0], [0], [1], [0, 0, 1, 1], [], []>} : vector<8x4xf32>, vector<4x32xf32>, vector<8x32xf32> -> vector<8x32xf32>
    %20 = arith.mulf %6, %19 : vector<8x32xf32>
    %c0_10 = arith.constant 0 : index
    %c0_11 = arith.constant 0 : index
    %21 = vector.load %arg5[%c0_10, %c0_11] : memref<32x8xf32, #tpu.memory_space<vmem>>, vector<32x8xf32>
    %cst_12 = arith.constant dense<0.000000e+00> : vector<8x8xf32>
    %22 = tpu.matmul %20, %21, %cst_12 {dimension_numbers = #tpu.dot_dimension_numbers<[1], [0], [0], [1], [0, 0, 1, 1], [], []>} : vector<8x32xf32>, vector<32x8xf32>, vector<8x8xf32> -> vector<8x8xf32>
    %c0_13 = arith.constant 0 : index
    %c0_14 = arith.constant 0 : index
    %23 = vector.load %arg6[%c0_13, %c0_14] : memref<8x8xf32, #tpu.memory_space<vmem>>, vector<8x8xf32>
    tpu.vector_store %arg6[%c0_13, %c0_14], %22 {strides = array<i32>} : memref<8x8xf32, #tpu.memory_space<vmem>>, vector<8x8xf32>,
    return
  }
  func.func @transform_0(%arg0: i32) -> (i32, i32) {
    %c0_i32 = arith.constant 0 : i32
    %c0_i32_0 = arith.constant 0 : i32
    return %arg0, %c0_i32 : i32, i32
  }
  func.func @transform_1(%arg0: i32) -> (i32, i32) {
    %c0_i32 = arith.constant 0 : i32
    %c0_i32_0 = arith.constant 0 : i32
    %c0_i32_1 = arith.constant 0 : i32
    return %c0_i32, %c0_i32_0 : i32, i32
  }
  func.func @transform_2(%arg0: i32) -> (i32, i32) {
    %c0_i32 = arith.constant 0 : i32
    %c0_i32_0 = arith.constant 0 : i32
    %c0_i32_1 = arith.constant 0 : i32
    return %c0_i32, %c0_i32_0 : i32, i32
  }
  func.func @transform_3(%arg0: i32) -> (i32, i32) {
    %c0_i32 = arith.constant 0 : i32
    %c0_i32_0 = arith.constant 0 : i32
    %c0_i32_1 = arith.constant 0 : i32
    return %c0_i32, %c0_i32_0 : i32, i32
  }
  func.func @transform_4(%arg0: i32) -> (i32, i32) {
    %c0_i32 = arith.constant 0 : i32
    %c0_i32_0 = arith.constant 0 : i32
    %c0_i32_1 = arith.constant 0 : i32
    return %c0_i32, %c0_i32_0 : i32, i32
  }
  func.func @transform_5(%arg0: i32) -> (i32, i32) {
    %c0_i32 = arith.constant 0 : i32
    %c0_i32_0 = arith.constant 0 : i32
    return %arg0, %c0_i32 : i32, i32
  }
}

</mosaic_0001>

<bundles_post_ra>
// kernel: tpu_custom_call.1
= control target key start
LH: loop header
LB: loop body
LE: loop exit
PB: predicated region body
PF: predicated region fallthrough
CT: control target
= control target key end

     0   :  { %v387_v3 = vmov 0.0|0.0   ;;  %vm388_vm0 = vmmov 0   ;;  %v389_v6 = vmov 0.0   ;;  %s474_s0 = inlined_call_operand.vmem [shape: f32[8,32], index: 0, kind: input, shape index: {}]   ;;  %s475_s1 = inlined_call_operand.vmem [shape: f32[32,36], index: 1, kind: input, shape index: {}]   ;;  %s476_s2 = inlined_call_operand.vmem [shape: f32[1,36], index: 2, kind: input, shape index: {}]   ;;  %s477_s3 = inlined_call_operand.vmem [shape: f32[4,32], index: 3, kind: input, shape index: {}]   ;;  %s478_s4 = inlined_call_operand.vmem [shape: f32[32,8], index: 4, kind: input, shape index: {}]   ;;  %s479_s5 = inlined_call_operand.hbm [shape: f32[8,8], index: 5, kind: output, shape index: {}]  }
   0x1   :  { %v22_v0 = vld [vmem:[%s475_s1] sm:$0xff]  ;;  %v23_v1 = vld [vmem:[%s475_s1 + $0x8] sm:$0xff]  ;;  %v24_v2 = vld [vmem:[%s475_s1 + $0x10] sm:$0xff]  ;;  %342 = vmatprep.subr.bf16.mxu0 %v387_v3  ;;  %323 = vmatprep.mubr.msk.f32.mxu0 %vm388_vm0, %v389_v6 }
   0x2   :  { %v343_v4 = vpack.c.bf16 %v23_v1, %v22_v0  ;;  %v25_v5 = vld [vmem:[%s475_s1 + $0x18] sm:$0xff]  ;;  %326 = vmatprep.subr.mxu1 %v389_v6  ;;  %328 = vmatprep.mubr.msk.f32.mxu1 %vm388_vm0, %v389_v6 }
   0x3   :  { %10 = vsyncpa [#allocation3], 0  ;;  %v346_v7 = vpack.c.bf16 %v25_v5, %v24_v2  ;;  %v21_v8 = vld [vmem:[%s474_s0] sm:$0xff]  ;;  %vm33_vm1 = vcmask 261120   ;;  %vm107_vm2 = vcmask 294144   ;;  %s390_s29 = smov 96  }
   0x4   :  { %344 = vmatpush3.bf16.msra.mxu0 %v343_v4  ;;  %v298_v9 = vld [vmem:[%s476_s2] ss:$0 sm:$0xff]  ;;  %vm118_vm3 = vcmask 31744   ;;  %vm130_vm4 = vcmask 1043456   ;;  %v206_v25 = vld [vmem:[%s478_s4 + $0x8] sm:$0xff]  ;;  %v207_v28 = vld [vmem:[%s478_s4 + $0x10] sm:$0xff] }
   0x5   :  { %345 = vmatprep.subr.bf16.mxu0 %v387_v3  ;;  %v124_v20 = vld [vmem:[%s477_s3] sm:$0xf]  ;;  %v208_v29 = vld [vmem:[%s478_s4 + $0x18] sm:$0xff]  ;;  %s391_s12 = smov [#allocation2]   ;;  %vm282_vm5 = vcmask 64512  }
   0x6   :  { %327 = vmatpush3.msk.msra.mxu1 %vm130_vm4, %v124_v20  ;;  %v205_v24 = vld [vmem:[%s478_s4] sm:$0xff]  ;;  %v352_v30 = vpack.c.bf16 %v208_v29, %v207_v28  ;;  %s290_s13 = sshll.u32 %s391_s12, 4  ;;  %s291_s13 = int_to_ptr.vmem [resolvable:$true] %s290_s13 }
   0x7   :  { %348 = vmatprep.subr.bf16.mxu1 %v387_v3  ;;  %v349_v26 = vpack.c.bf16 %v206_v25, %v205_v24  ;;  %s363_s14 = scalar_lea.vmem %s291_s13, 128  ;;  %p368_p1 = scmp.lt.s32.totalorder %s291_s13, %s291_s13 }
   0x8   :  { %347 = vmatpush3.bf16.msra.mxu0 %v346_v7  ;;  %p364_p0 = scmp.ne.s32.totalorder %s291_s13, %s363_s14  ;;  %p369_p2 = scmp.lt.s32.totalorder %s363_s14, %s363_s14 }
   0xa   :  { %p370_p3 = por %p369_p2, %p368_p1 }
   0xb   :  { %324 = vmatmul.mubr.msk.f32.vlgmr.msra.gmra.mrb[0].mxu0 %vm33_vm1, %v21_v8 }
   0xc   :  { %p371_p4 = pnand %p370_p3, %p364_p0 }
  0xde   :  { %v103_v10 = vpop.f32.mrb[0].mxu0 }
  0xdf   :  { %v104_v11 = vadd.f32 %v298_v9, %v103_v10  ;;  %v325_v12 = vpop.f32.mrb[1].mxu0 }
  0xe1   :  { %v108_v13 = vsel %vm107_vm2, %v104_v11, -inf }
  0xe2   :  { %109 = vmax.xlane.f32.xlu0 %v108_v13 }
 0x16f   :  { %v110_v14 = vpop.xlane.xlu0 %109 }
 0x170   :  { %v111_v15 = vsub.f32 %v104_v11, %v110_v14 }
 0x172   :  { %v112_v16 = vmul.f32 1.442695, %v111_v15 }
 0x174   :  { %359 = vpow2.f32 %v112_v16 }
 0x17e   :  { %v360_v17 = vpop.eup %359 }
 0x17f   :  { %115 = vrot.lane.b32.xlu0 %v360_v17, %s390_s29 }
 0x1f1   :  { %v116_v18 = vpop.permute.xlu0 %115 }
 0x1f2   :  { %v119_v19 = vsel %vm118_vm3, %v116_v18, 0.0 }
 0x1f3   :  { %120 = vadd.xlane.f32.xlu1 %v119_v19 }
 0x280   :  { %v121_v21 = vpop.xlane.xlu1 %120 }
 0x281   :  { %361 = vrcp.f32 %v121_v21 }
 0x28b   :  { %v362_v22 = vpop.eup %361 }
 0x28c   :  { %v123_v23 = vmul.f32 %v362_v22, %v360_v17 }
 0x28e   :  { %126 = vrot.lane.b32.xlu1 %v123_v23, %s390_s29 }
 0x300   :  { %v127_v27 = vpop.permute.xlu1 %126 }
 0x301   :  { %329 = vmatmul.mubr.msk.f32.vlgmr.msra.gmra.mrb[0].mxu1 %vm118_vm3, %v127_v27 }
 0x302   :  { %350 = vmatpush3.bf16.msra.mxu1 %v349_v26  ;;  %339 = vmatprep.mubr.msk.f32.mxu1 %vm388_vm0, %v389_v6 }
 0x303   :  { %351 = vmatprep.subr.bf16.mxu1 %v387_v3 }
 0x306   :  { %353 = vmatpush3.bf16.msra.mxu1 %v352_v30 }
 0x3d4   :  { %v200_v31 = vpop.f32.mrb[0].mxu1 }
 0x3d5   :  { %v204_v32 = vmul.f32 %v200_v31, %v104_v11  ;;  %v330_v33 = vpop.f32.mrb[1].mxu1 }
 0x3d7   :  { %340 = vmatmul.mubr.msk.f32.vlgmr.msra.gmra.mrb[2].mxu1 %vm33_vm1, %v204_v32 }
 0x4aa   :  { %v278_v34 = vpop.f32.mrb[2].mxu1 }
 0x4ab   :  { %283 = vst.msk [vmem:[#allocation2] sm:$0xff] %vm282_vm5, %v278_v34  ;;  %v341_v35 = vpop.f32.mrb[3].mxu1 }
 0x4ac   :  { %374 = shalt.err (!%p371_p4)
}
 0x4ad   :  { %s375_s16 = scalar_lea.hbm %s479_s5, 128 }
 0x4ae   :  { %p376_p5 = scmp.ne.s32.totalorder %s479_s5, %s375_s16  ;;  %p379_p6 = scmp.lt.u32.totalorder %s375_s16, %s479_s5 }
 0x4b0   :  { %p381_p7 = pnand %p379_p6, %p376_p5 }
 0x4b2   :  { %384 = shalt.err (!%p381_p7)
}
 0x4b3   :  { %293 = dma.vmem_to_hbm [thread:$0]  %s291_s13, 128, %s479_s5, [#allocation3]  }
 0x4b4   :  { %385 = dma.done.wait [#allocation3], 128  }
 0x4b5   :  { %386 = vsyncadd [#allocation3], 4294967168 }
 0x4b6   :  { %297 = vsyncpa [#allocation3], 1 }

</bundles_post_ra>
